<compile_context>
chip_gen: v7x
topology: tpu7x:2x2x1
jax: 0.10.0
libtpu: 0.0.40
codegen_flags: <defaults>
</compile_context>

<pallas_src>
import numpy as np
import jax
import jax.numpy as jnp
from jax.experimental import pallas as pl
from jax.experimental.pallas import tpu as pltpu


def _round_up(x: int, m: int) -> int:
    return (x + m - 1) // m * m


def _vmem_budgets():
    """Returns (per-tile working-set budget, vmem_limit_bytes) per generation."""
    phys = 128 * 1024 * 1024
    try:
        phys = int(pltpu.get_tpu_info().vmem_capacity_bytes)
    except Exception:
        pass
    if phys <= 64 * 1024 * 1024:
        # v7x: 64 MiB physical / 32 MiB scoped per TensorCore.
        return 24 * 1024 * 1024, 32 * 1024 * 1024
    # v5e / v6e: 128 MiB physical -> allow much larger tiles.
    return 48 * 1024 * 1024, 64 * 1024 * 1024


def _choose_block_rows(n_tokens, din, h, num_layers, *, in_bytes, hn_bytes,
                       weight_buffers, vmem_budget_bytes):
    """Largest row tile TM (multiple of 8, floor 256) whose working set fits."""
    n8 = _round_up(max(n_tokens, 1), 8)
    # Resident weights + biases (single-buffered when pipeline_mode allows it).
    weight_bytes = 0
    in_dim = din
    for _ in range(num_layers):
        weight_bytes += (in_dim * h * in_bytes + h * 4) * weight_buffers
        in_dim = h
    # Cap TM so there are >= 2 row tiles to shard across v7x's two TensorCores
    # (each tile still >= 256 rows); harmless on single-TC v5e/v6e.
    cap = n8 if n8 < 512 else _round_up((n8 + 1) // 2, 8)
    for tm in (1024, 512, 256):
        if tm > cap:
            continue
        tile_io = 2 * tm * din * in_bytes + 2 * num_layers * tm * h * hn_bytes
        if tile_io + weight_bytes <= vmem_budget_bytes:
            return tm
    # Floor at 256 rows (or the whole token range if smaller): per-grid-step
    # overhead (~0.35us) makes tiny tiles fall off the HBM roofline.
    # TODO(synk): for very large H / deep L configs, stream weights per layer
    # (pltpu.emit_pipeline) instead of relying on the 256-row floor.
    return min(256, n8)


def _make_mlp_kernel(num_layers: int, compute_dtype):
    """Fused per-token MLP for one row tile.

    Ref order: x, (W_0, b_0), ..., (W_{L-1}, b_{L-1}), h_n (stacked (L, TM, H)).
    """

    def kernel(*refs):
        x_ref = refs[0]
        layer_refs = refs[1:1 + 2 * num_layers]
        hn_ref = refs[1 + 2 * num_layers]

        h = x_ref[...].astype(compute_dtype)
        for l in range(num_layers):
            w = layer_refs[2 * l][...]          # (K, H), compute_dtype
            b = layer_refs[2 * l + 1][...]      # (1, H), f32
            # NNCell: igate = x @ W_ih + b_ih ; NNLayer nonlinearity: relu.
            acc = jnp.dot(h, w, preferred_element_type=jnp.float32) + b
            hf = jnp.maximum(acc, 0.0)
            # TODO(synk): inter-layer nn.Dropout is identity here (p=0.0 / eval);
            # training-mode stochastic dropout is not implemented.
            hn_ref[l, :, :] = hf.astype(hn_ref.dtype)
            h = hf.astype(compute_dtype)

    return kernel


def cnn_forward(x, layer_params, compute_dtype=jnp.float32, hn_dtype=None):
    """x: (batch, seq, input_size) float32 (batch_first=True).

    Returns (out, h_n) matching cNN.forward (relu, no norm, dropout=0, int hidden):
      out : (batch, seq, hidden_size)       == h_n[-1]
      h_n : (num_layers, batch, seq, hidden_size)
    """
    num_layers = len(layer_params)
    if num_layers < 1:
        raise ValueError("cNN requires num_layers >= 1")
    B, S, Din = x.shape
    H = layer_params[0][0].shape[1]
    N = B * S
    if hn_dtype is None:
        hn_dtype = jnp.float32

    in_bytes = jnp.dtype(compute_dtype).itemsize
    hn_bytes = jnp.dtype(hn_dtype).itemsize
    budget, vmem_limit = _vmem_budgets()
    TM = _choose_block_rows(N, Din, H, num_layers, in_bytes=in_bytes,
                            hn_bytes=hn_bytes, weight_buffers=1,
                            vmem_budget_bytes=budget)
    grid_rows = pl.cdiv(N, TM)
    N_pad = grid_rows * TM

    x2d = x.reshape(N, Din).astype(compute_dtype)
    if N_pad != N:
        # Only the token (row) dim ever needs padding; padded rows produce
        # discarded output rows. Feature dims stay at their natural extent
        # (block shape == full array dim), so no feature pad / slice copies.
        x2d = jnp.pad(x2d, ((0, N_pad - N), (0, 0)))

    inputs = [x2d]
    weight_shapes = []
    flops = 0
    bytes_accessed = N_pad * Din * in_bytes + num_layers * N_pad * H * hn_bytes
    in_dim = Din
    for (W, b) in layer_params:
        inputs.append(W.astype(compute_dtype))
        inputs.append(b.reshape(1, -1).astype(jnp.float32))
        weight_shapes.append(((in_dim, H), (1, H)))
        flops += 2 * N * in_dim * H
        bytes_accessed += in_dim * H * in_bytes + H * 4
        in_dim = H

    hn_shape = jax.ShapeDtypeStruct((num_layers, N_pad, H), hn_dtype)
    x_spec = pl.BlockSpec((TM, Din), lambda i: (i, 0))
    hn_spec = pl.BlockSpec((num_layers, TM, H), lambda i: (0, i, 0))
    cost = pl.CostEstimate(flops=int(flops), transcendentals=0,
                           bytes_accessed=int(bytes_accessed))

    def run(single_buffer_weights):
        in_specs = [x_spec]
        for (w_shape, b_shape) in weight_shapes:
            kwargs = {}
            if single_buffer_weights:
                # Constant index map -> never re-fetched; single buffer halves
                # resident weight VMEM (matters most on 64 MiB v7x).
                kwargs = dict(pipeline_mode=pl.Buffered(1))
            in_specs.append(pl.BlockSpec(w_shape, lambda i: (0, 0), **kwargs))
            in_specs.append(pl.BlockSpec(b_shape, lambda i: (0, 0), **kwargs))
        return pl.pallas_call(
            _make_mlp_kernel(num_layers, compute_dtype),
            grid=(grid_rows,),
            in_specs=in_specs,
            out_specs=hn_spec,
            out_shape=hn_shape,
            cost_estimate=cost,
            compiler_params=pltpu.CompilerParams(
                # Row tiles are independent -> shard across both TCs on v7x.
                dimension_semantics=("parallel",),
                vmem_limit_bytes=vmem_limit,
            ),
        )(*inputs)

    try:
        hn = run(single_buffer_weights=True)
    except Exception:
        # Some JAX versions reject pipeline_mode=pl.Buffered(1); fall back to
        # the default double-buffered weights (identical semantics).
        hn = run(single_buffer_weights=False)

    if N_pad != N:
        hn = hn[:, :N, :]
    h_n = hn.reshape(num_layers, B, S, H)
    # cNN's first return value is identical to the last h_n slab; return it as
    # a view instead of writing the same tile to HBM twice in the kernel.
    out = h_n[num_layers - 1]
    return out, h_n


def init_params(key, input_size, hidden_size, num_layers):
    """Mirror NNCell init: weight_ih ~ N(0, sqrt(2/input_size)), bias_ih = 0."""
    layer_params = []
    in_dim = input_size
    for _ in range(num_layers):
        key, k = jax.random.split(key)
        W = jax.random.normal(k, (in_dim, hidden_size), jnp.float32) * jnp.sqrt(
            2.0 / in_dim
        )
        b = jnp.zeros((hidden_size,), jnp.float32)
        layer_params.append((W, b))
        in_dim = hidden_size
    return layer_params


def reference_forward(x, layer_params):
    """Pure-JAX reference matching cNN.forward semantics."""
    B, S, Din = x.shape
    h = x.reshape(B * S, Din)
    hs = []
    for (W, b) in layer_params:
        h = jnp.maximum(h @ W + b, 0.0)
        hs.append(h)
    H = hs[-1].shape[-1]
    out = h.reshape(B, S, H)
    h_n = jnp.stack([hh.reshape(B, S, H) for hh in hs], axis=0)
    return out, h_n


if __name__ == "__main__":
    # Small shapes: batch=2, seq=8, input_size=16, hidden_size=32, num_layers=2.
    batch, seq, input_size, hidden_size, num_layers = 2, 8, 16, 32, 2

    key = jax.random.PRNGKey(0)
    key, kx = jax.random.split(key)
    x = jax.random.normal(kx, (batch, seq, input_size), jnp.float32)
    layer_params = init_params(key, input_size, hidden_size, num_layers)

    # Exact f32 path.
    out, h_n = cnn_forward(x, layer_params)
    out = jax.block_until_ready(out)
    h_n = jax.block_until_ready(h_n)

    ref_out, ref_h_n = reference_forward(x, layer_params)
    np.testing.assert_allclose(np.asarray(out), np.asarray(ref_out),
                               rtol=1e-5, atol=1e-5)
    np.testing.assert_allclose(np.asarray(h_n), np.asarray(ref_h_n),
                               rtol=1e-5, atol=1e-5)
    assert out.shape == (batch, seq, hidden_size)
    assert h_n.shape == (num_layers, batch, seq, hidden_size)

    # bf16 fast path (halves x/W/h_n DMA bytes on v6e/v7x; f32 accumulation).
    out_bf, h_n_bf = cnn_forward(x, layer_params,
                                 compute_dtype=jnp.bfloat16,
                                 hn_dtype=jnp.bfloat16)
    out_bf = jax.block_until_ready(out_bf)
    np.testing.assert_allclose(np.asarray(jnp.asarray(out_bf, jnp.float32)),
                               np.asarray(ref_out), rtol=1e-1, atol=1e-1)

    print("KERNEL_OK")
</pallas_src>

<mosaic_0001>
module attributes {stable_mosaic.version = 11 : i64} {
  func.func @kernel(%arg0: i32, %arg1: memref<16x16xf32, #tpu.memory_space<vmem>>, %arg2: memref<16x32xf32, #tpu.memory_space<vmem>>, %arg3: memref<1x32xf32, #tpu.memory_space<vmem>>, %arg4: memref<32x32xf32, #tpu.memory_space<vmem>>, %arg5: memref<1x32xf32, #tpu.memory_space<vmem>>, %arg6: memref<2x16x32xf32, #tpu.memory_space<vmem>>) attributes {dimension_semantics = [#tpu.dimension_semantics<parallel>], iteration_bounds = array<i64: 1>, scalar_prefetch = 0 : i64, scratch_operands = 0 : i64, tpu.core_type = #tpu.core_type<tc>, window_params = [{transform_indices = @transform_0, window_bounds = array<i64: 16, 16>}, {pipeline_mode = #tpu.pipeline_mode<synchronous>, transform_indices = @transform_1, window_bounds = array<i64: 16, 32>}, {pipeline_mode = #tpu.pipeline_mode<synchronous>, transform_indices = @transform_2, window_bounds = array<i64: 1, 32>}, {pipeline_mode = #tpu.pipeline_mode<synchronous>, transform_indices = @transform_3, window_bounds = array<i64: 32, 32>}, {pipeline_mode = #tpu.pipeline_mode<synchronous>, transform_indices = @transform_4, window_bounds = array<i64: 1, 32>}, {transform_indices = @transform_5, window_bounds = array<i64: 2, 16, 32>}]} {
    %c0 = arith.constant 0 : index
    %c0_0 = arith.constant 0 : index
    %0 = vector.load %arg1[%c0, %c0_0] : memref<16x16xf32, #tpu.memory_space<vmem>>, vector<16x16xf32>
    %c0_1 = arith.constant 0 : index
    %c0_2 = arith.constant 0 : index
    %1 = vector.load %arg2[%c0_1, %c0_2] : memref<16x32xf32, #tpu.memory_space<vmem>>, vector<16x32xf32>
    %c0_3 = arith.constant 0 : index
    %c0_4 = arith.constant 0 : index
    %2 = vector.load %arg3[%c0_3, %c0_4] : memref<1x32xf32, #tpu.memory_space<vmem>>, vector<1x32xf32>
    %cst = arith.constant dense<0.000000e+00> : vector<16x32xf32>
    %3 = tpu.matmul %0, %1, %cst {dimension_numbers = #tpu.dot_dimension_numbers<[1], [0], [0], [1], [0, 0, 1, 1], [], []>} : vector<16x16xf32>, vector<16x32xf32>, vector<16x32xf32> -> vector<16x32xf32>
    %4 = vector.broadcast %2 : vector<1x32xf32> to vector<16x32xf32>
    %5 = arith.addf %3, %4 : vector<16x32xf32>
    %cst_5 = arith.constant 0.000000e+00 : f32
    %6 = vector.broadcast %cst_5 : f32 to vector<16x32xf32>
    %7 = arith.maximumf %5, %6 : vector<16x32xf32>
    %c0_6 = arith.constant 0 : index
    %c0_7 = arith.constant 0 : index
    %c0_8 = arith.constant 0 : index
    %8 = vector.load %arg6[%c0_6, %c0_7, %c0_8] : memref<2x16x32xf32, #tpu.memory_space<vmem>>, vector<1x16x32xf32>
    %9 = vector.shape_cast %8 : vector<1x16x32xf32> to vector<16x32xf32>
    %10 = vector.shape_cast %7 : vector<16x32xf32> to vector<1x16x32xf32>
    tpu.vector_store %arg6[%c0_6, %c0_7, %c0_8], %10 {strides = array<i32>} : memref<2x16x32xf32, #tpu.memory_space<vmem>>, vector<1x16x32xf32>,
    %c0_9 = arith.constant 0 : index
    %c0_10 = arith.constant 0 : index
    %11 = vector.load %arg4[%c0_9, %c0_10] : memref<32x32xf32, #tpu.memory_space<vmem>>, vector<32x32xf32>
    %c0_11 = arith.constant 0 : index
    %c0_12 = arith.constant 0 : index
    %12 = vector.load %arg5[%c0_11, %c0_12] : memref<1x32xf32, #tpu.memory_space<vmem>>, vector<1x32xf32>
    %cst_13 = arith.constant dense<0.000000e+00> : vector<16x32xf32>
    %13 = tpu.matmul %7, %11, %cst_13 {dimension_numbers = #tpu.dot_dimension_numbers<[1], [0], [0], [1], [0, 0, 1, 1], [], []>} : vector<16x32xf32>, vector<32x32xf32>, vector<16x32xf32> -> vector<16x32xf32>
    %14 = vector.broadcast %12 : vector<1x32xf32> to vector<16x32xf32>
    %15 = arith.addf %13, %14 : vector<16x32xf32>
    %cst_14 = arith.constant 0.000000e+00 : f32
    %16 = vector.broadcast %cst_14 : f32 to vector<16x32xf32>
    %17 = arith.maximumf %15, %16 : vector<16x32xf32>
    %c1 = arith.constant 1 : index
    %c0_15 = arith.constant 0 : index
    %c0_16 = arith.constant 0 : index
    %18 = vector.load %arg6[%c1, %c0_15, %c0_16] : memref<2x16x32xf32, #tpu.memory_space<vmem>>, vector<1x16x32xf32>
    %19 = vector.shape_cast %18 : vector<1x16x32xf32> to vector<16x32xf32>
    %20 = vector.shape_cast %17 : vector<16x32xf32> to vector<1x16x32xf32>
    tpu.vector_store %arg6[%c1, %c0_15, %c0_16], %20 {strides = array<i32>} : memref<2x16x32xf32, #tpu.memory_space<vmem>>, vector<1x16x32xf32>,
    return
  }
  func.func @transform_0(%arg0: i32) -> (i32, i32) {
    %c0_i32 = arith.constant 0 : i32
    %c0_i32_0 = arith.constant 0 : i32
    return %arg0, %c0_i32 : i32, i32
  }
  func.func @transform_1(%arg0: i32) -> (i32, i32) {
    %c0_i32 = arith.constant 0 : i32
    %c0_i32_0 = arith.constant 0 : i32
    %c0_i32_1 = arith.constant 0 : i32
    return %c0_i32, %c0_i32_0 : i32, i32
  }
  func.func @transform_2(%arg0: i32) -> (i32, i32) {
    %c0_i32 = arith.constant 0 : i32
    %c0_i32_0 = arith.constant 0 : i32
    %c0_i32_1 = arith.constant 0 : i32
    return %c0_i32, %c0_i32_0 : i32, i32
  }
  func.func @transform_3(%arg0: i32) -> (i32, i32) {
    %c0_i32 = arith.constant 0 : i32
    %c0_i32_0 = arith.constant 0 : i32
    %c0_i32_1 = arith.constant 0 : i32
    return %c0_i32, %c0_i32_0 : i32, i32
  }
  func.func @transform_4(%arg0: i32) -> (i32, i32) {
    %c0_i32 = arith.constant 0 : i32
    %c0_i32_0 = arith.constant 0 : i32
    %c0_i32_1 = arith.constant 0 : i32
    return %c0_i32, %c0_i32_0 : i32, i32
  }
  func.func @transform_5(%arg0: i32) -> (i32, i32, i32) {
    %c0_i32 = arith.constant 0 : i32
    %c0_i32_0 = arith.constant 0 : i32
    %c0_i32_1 = arith.constant 0 : i32
    return %c0_i32, %arg0, %c0_i32_0 : i32, i32, i32
  }
}

module attributes {stable_mosaic.version = 11 : i64} {
  func.func @kernel(%arg0: i32, %arg1: memref<16x16xf32, #tpu.memory_space<vmem>>, %arg2: memref<16x32xf32, #tpu.memory_space<vmem>>, %arg3: memref<1x32xf32, #tpu.memory_space<vmem>>, %arg4: memref<32x32xf32, #tpu.memory_space<vmem>>, %arg5: memref<1x32xf32, #tpu.memory_space<vmem>>, %arg6: memref<2x16x32xf32, #tpu.memory_space<vmem>>) attributes {dimension_semantics = [#tpu.dimension_semantics<parallel>], iteration_bounds = array<i64: 1>, scalar_prefetch = 0 : i64, scratch_operands = 0 : i64, tpu.core_type = #tpu.core_type<tc>, window_params = [{transform_indices = @transform_0, window_bounds = array<i64: 16, 16>}, {pipeline_mode = #tpu.pipeline_mode<synchronous>, transform_indices = @transform_1, window_bounds = array<i64: 16, 32>}, {pipeline_mode = #tpu.pipeline_mode<synchronous>, transform_indices = @transform_2, window_bounds = array<i64: 1, 32>}, {pipeline_mode = #tpu.pipeline_mode<synchronous>, transform_indices = @transform_3, window_bounds = array<i64: 32, 32>}, {pipeline_mode = #tpu.pipeline_mode<synchronous>, transform_indices = @transform_4, window_bounds = array<i64: 1, 32>}, {transform_indices = @transform_5, window_bounds = array<i64: 2, 16, 32>}]} {
    %c0 = arith.constant 0 : index
    %c0_0 = arith.constant 0 : index
    %0 = vector.load %arg1[%c0, %c0_0] : memref<16x16xf32, #tpu.memory_space<vmem>>, vector<16x16xf32>
    %c0_1 = arith.constant 0 : index
    %c0_2 = arith.constant 0 : index
    %1 = vector.load %arg2[%c0_1, %c0_2] : memref<16x32xf32, #tpu.memory_space<vmem>>, vector<16x32xf32>
    %c0_3 = arith.constant 0 : index
    %c0_4 = arith.constant 0 : index
    %2 = vector.load %arg3[%c0_3, %c0_4] : memref<1x32xf32, #tpu.memory_space<vmem>>, vector<1x32xf32>
    %cst = arith.constant dense<0.000000e+00> : vector<16x32xf32>
    %3 = tpu.matmul %0, %1, %cst {dimension_numbers = #tpu.dot_dimension_numbers<[1], [0], [0], [1], [0, 0, 1, 1], [], []>} : vector<16x16xf32>, vector<16x32xf32>, vector<16x32xf32> -> vector<16x32xf32>
    %4 = vector.broadcast %2 : vector<1x32xf32> to vector<16x32xf32>
    %5 = arith.addf %3, %4 : vector<16x32xf32>
    %cst_5 = arith.constant 0.000000e+00 : f32
    %6 = vector.broadcast %cst_5 : f32 to vector<16x32xf32>
    %7 = arith.maximumf %5, %6 : vector<16x32xf32>
    %c0_6 = arith.constant 0 : index
    %c0_7 = arith.constant 0 : index
    %c0_8 = arith.constant 0 : index
    %8 = vector.load %arg6[%c0_6, %c0_7, %c0_8] : memref<2x16x32xf32, #tpu.memory_space<vmem>>, vector<1x16x32xf32>
    %9 = vector.shape_cast %8 : vector<1x16x32xf32> to vector<16x32xf32>
    %10 = vector.shape_cast %7 : vector<16x32xf32> to vector<1x16x32xf32>
    tpu.vector_store %arg6[%c0_6, %c0_7, %c0_8], %10 {strides = array<i32>} : memref<2x16x32xf32, #tpu.memory_space<vmem>>, vector<1x16x32xf32>,
    %c0_9 = arith.constant 0 : index
    %c0_10 = arith.constant 0 : index
    %11 = vector.load %arg4[%c0_9, %c0_10] : memref<32x32xf32, #tpu.memory_space<vmem>>, vector<32x32xf32>
    %c0_11 = arith.constant 0 : index
    %c0_12 = arith.constant 0 : index
    %12 = vector.load %arg5[%c0_11, %c0_12] : memref<1x32xf32, #tpu.memory_space<vmem>>, vector<1x32xf32>
    %cst_13 = arith.constant dense<0.000000e+00> : vector<16x32xf32>
    %13 = tpu.matmul %7, %11, %cst_13 {dimension_numbers = #tpu.dot_dimension_numbers<[1], [0], [0], [1], [0, 0, 1, 1], [], []>} : vector<16x32xf32>, vector<32x32xf32>, vector<16x32xf32> -> vector<16x32xf32>
    %14 = vector.broadcast %12 : vector<1x32xf32> to vector<16x32xf32>
    %15 = arith.addf %13, %14 : vector<16x32xf32>
    %cst_14 = arith.constant 0.000000e+00 : f32
    %16 = vector.broadcast %cst_14 : f32 to vector<16x32xf32>
    %17 = arith.maximumf %15, %16 : vector<16x32xf32>
    %c1 = arith.constant 1 : index
    %c0_15 = arith.constant 0 : index
    %c0_16 = arith.constant 0 : index
    %18 = vector.load %arg6[%c1, %c0_15, %c0_16] : memref<2x16x32xf32, #tpu.memory_space<vmem>>, vector<1x16x32xf32>
    %19 = vector.shape_cast %18 : vector<1x16x32xf32> to vector<16x32xf32>
    %20 = vector.shape_cast %17 : vector<16x32xf32> to vector<1x16x32xf32>
    tpu.vector_store %arg6[%c1, %c0_15, %c0_16], %20 {strides = array<i32>} : memref<2x16x32xf32, #tpu.memory_space<vmem>>, vector<1x16x32xf32>,
    return
  }
  func.func @transform_0(%arg0: i32) -> (i32, i32) {
    %c0_i32 = arith.constant 0 : i32
    %c0_i32_0 = arith.constant 0 : i32
    return %arg0, %c0_i32 : i32, i32
  }
  func.func @transform_1(%arg0: i32) -> (i32, i32) {
    %c0_i32 = arith.constant 0 : i32
    %c0_i32_0 = arith.constant 0 : i32
    %c0_i32_1 = arith.constant 0 : i32
    return %c0_i32, %c0_i32_0 : i32, i32
  }
  func.func @transform_2(%arg0: i32) -> (i32, i32) {
    %c0_i32 = arith.constant 0 : i32
    %c0_i32_0 = arith.constant 0 : i32
    %c0_i32_1 = arith.constant 0 : i32
    return %c0_i32, %c0_i32_0 : i32, i32
  }
  func.func @transform_3(%arg0: i32) -> (i32, i32) {
    %c0_i32 = arith.constant 0 : i32
    %c0_i32_0 = arith.constant 0 : i32
    %c0_i32_1 = arith.constant 0 : i32
    return %c0_i32, %c0_i32_0 : i32, i32
  }
  func.func @transform_4(%arg0: i32) -> (i32, i32) {
    %c0_i32 = arith.constant 0 : i32
    %c0_i32_0 = arith.constant 0 : i32
    %c0_i32_1 = arith.constant 0 : i32
    return %c0_i32, %c0_i32_0 : i32, i32
  }
  func.func @transform_5(%arg0: i32) -> (i32, i32, i32) {
    %c0_i32 = arith.constant 0 : i32
    %c0_i32_0 = arith.constant 0 : i32
    %c0_i32_1 = arith.constant 0 : i32
    return %c0_i32, %arg0, %c0_i32_0 : i32, i32, i32
  }
}

</mosaic_0001>

<bundles_post_ra>
// kernel: tpu_custom_call.1
= control target key start
LH: loop header
LB: loop body
LE: loop exit
PB: predicated region body
PF: predicated region fallthrough
CT: control target
= control target key end

     0   :  { %10 = vsyncpa [#allocation3], 0  ;;  %s628_s0 = inlined_call_operand.hbm [shape: f32[16,16], index: 0, kind: input, shape index: {}]   ;;  %s629_s1 = inlined_call_operand.hbm [shape: f32[16,32], index: 1, kind: input, shape index: {}]   ;;  %s630_s2 = inlined_call_operand.hbm [shape: f32[1,32], index: 2, kind: input, shape index: {}]   ;;  %s631_s3 = inlined_call_operand.hbm [shape: f32[32,32], index: 3, kind: input, shape index: {}]   ;;  %s632_s4 = inlined_call_operand.hbm [shape: f32[1,32], index: 4, kind: input, shape index: {}]   ;;  %s633_s5 = inlined_call_operand.hbm [shape: f32[2,16,32], index: 5, kind: output, shape index: {}]  }
   0x1   :  { %11 = vsyncpa [#allocation6], 0 }
   0x2   :  { %12 = vsyncpa [#allocation9], 0 }
   0x3   :  { %13 = vsyncpa [#allocation4], 0  ;;  %s493_s18 = smov [#allocation5]   ;;  %s494_s20 = smov [#allocation8]  }
   0x4   :  { %s31_s19 = sshll.u32 %s493_s18, 4  ;;  %s53_s21 = sshll.u32 %s494_s20, 4  ;;  %s32_s19 = int_to_ptr.vmem [resolvable:$true] %s31_s19  ;;  %s531_s21 = int_to_ptr.vmem [resolvable:$true] %s53_s21 }
   0x5   :  { %s353_s24 = scalar_lea.hbm %s629_s1, 256 }
   0x6   :  { %p354_p0 = scmp.ne.s32.totalorder %s629_s1, %s353_s24  ;;  %p357_p1 = scmp.lt.u32.totalorder %s353_s24, %s629_s1 }
   0x8   :  { %p359_p2 = pnand %p357_p1, %p354_p0 }
   0xa   :  { %362 = shalt.err (!%p359_p2)
}
   0xb   :  { %s363_s29 = scalar_lea.vmem %s32_s19, 256  ;;  %p368_p4 = scmp.lt.s32.totalorder %s32_s19, %s32_s19 }
   0xc   :  { %p364_p3 = scmp.ne.s32.totalorder %s32_s19, %s363_s29  ;;  %p369_p5 = scmp.lt.s32.totalorder %s363_s29, %s363_s29 }
   0xe   :  { %p370_p6 = por %p369_p5, %p368_p4 }
  0x10   :  { %p371_p7 = pnand %p370_p6, %p364_p3 }
  0x12   :  { %374 = shalt.err (!%p371_p7)
}
  0x13   :  { %s495_s30 = smov 128   ;;  %s496_s6 = smov 8  }
  0x14   :  { %37 = dma.hbm_to_vmem [thread:$0]  %s629_s1, 256, %s32_s19, [#allocation6], %s495_s30, %s495_s30, %s496_s6  }
  0x15   :  { %s375_s11 = scalar_lea.hbm %s631_s3, 512 }
  0x16   :  { %p376_p8 = scmp.ne.s32.totalorder %s631_s3, %s375_s11  ;;  %p379_p9 = scmp.lt.u32.totalorder %s375_s11, %s631_s3 }
  0x18   :  { %p381_p10 = pnand %p379_p9, %p376_p8 }
  0x1a   :  { %384 = shalt.err (!%p381_p10)
}
  0x1b   :  { %s385_s16 = scalar_lea.vmem %s531_s21, 512  ;;  %p390_p12 = scmp.lt.s32.totalorder %s531_s21, %s531_s21 }
  0x1c   :  { %p386_p11 = scmp.ne.s32.totalorder %s531_s21, %s385_s16  ;;  %p391_p13 = scmp.lt.s32.totalorder %s385_s16, %s385_s16 }
  0x1e   :  { %p392_p0 = por %p391_p13, %p390_p12 }
  0x20   :  { %p393_p1 = pnand %p392_p0, %p386_p11 }
  0x22   :  { %396 = shalt.err (!%p393_p1)
}
  0x23   :  { %59 = dma.hbm_to_vmem [thread:$0]  %s631_s3, 512, %s531_s21, [#allocation9], %s495_s30, %s495_s30, %s496_s6  }
  0x24   :  { %s497_s18 = smov [#allocation2]   ;;  %s498_s20 = smov [#allocation7]  }
  0x25   :  { %s19_s19 = sshll.u32 %s497_s18, 4  ;;  %s44_s22 = sshll.u32 %s498_s20, 4  ;;  %s20_s19 = int_to_ptr.vmem [resolvable:$true] %s19_s19  ;;  %s45_s22 = int_to_ptr.vmem [resolvable:$true] %s44_s22 }
  0x26   :  { %s397_s25 = scalar_lea.hbm %s628_s0, 256 }
  0x27   :  { %p398_p2 = scmp.ne.s32.totalorder %s628_s0, %s397_s25  ;;  %p401_p3 = scmp.lt.u32.totalorder %s397_s25, %s628_s0 }
  0x29   :  { %p403_p4 = pnand %p401_p3, %p398_p2 }
  0x2b   :  { %406 = shalt.err (!%p403_p4)
}
  0x2c   :  { %s407_s3 = scalar_lea.vmem %s20_s19, 256  ;;  %p412_p6 = scmp.lt.s32.totalorder %s20_s19, %s20_s19 }
  0x2d   :  { %p408_p5 = scmp.ne.s32.totalorder %s20_s19, %s407_s3  ;;  %p413_p7 = scmp.lt.s32.totalorder %s407_s3, %s407_s3 }
  0x2f   :  { %p414_p8 = por %p413_p7, %p412_p6 }
  0x31   :  { %p415_p9 = pnand %p414_p8, %p408_p5 }
  0x33   :  { %418 = shalt.err (!%p415_p9)
}
  0x34   :  { %25 = dma.hbm_to_vmem [thread:$0]  %s628_s0, 256, %s20_s19, [#allocation3], %s495_s30, %s495_s30, %s496_s6  }
  0x35   :  { %s419_s10 = scalar_lea.hbm %s630_s2, 16 }
  0x36   :  { %p420_p10 = scmp.ne.s32.totalorder %s630_s2, %s419_s10  ;;  %p423_p11 = scmp.lt.u32.totalorder %s419_s10, %s630_s2 }
  0x38   :  { %p425_p12 = pnand %p423_p11, %p420_p10 }
  0x3a   :  { %428 = shalt.err (!%p425_p12)
}
  0x3b   :  { %s429_s15 = scalar_lea.vmem %s45_s22, 16  ;;  %s433_s16 = scalar_lea.vmem %s45_s22, 32 }
  0x3c   :  { %p430_p13 = scmp.ne.s32.totalorder %s45_s22, %s429_s15  ;;  %p434_p0 = scmp.lt.s32.totalorder %s45_s22, %s45_s22 }
  0x3d   :  { %p435_p1 = scmp.lt.s32.totalorder %s433_s16, %s429_s15 }
  0x3f   :  { %p436_p2 = por %p435_p1, %p434_p0 }
  0x41   :  { %p437_p3 = pnand %p436_p2, %p430_p13 }
  0x43   :  { %440 = shalt.err (!%p437_p3)
}
  0x44   :  { %47 = dma.hbm_to_vmem [thread:$0]  %s630_s2, 16, %s45_s22, [#allocation6]  }
  0x45   :  { %s499_s17 = smov [#allocation10]   ;;  %s441_s23 = scalar_lea.hbm %s632_s4, 16 }
  0x46   :  { %s66_s18 = sshll.u32 %s499_s17, 4  ;;  %p442_p4 = scmp.ne.s32.totalorder %s632_s4, %s441_s23  ;;  %s67_s18 = int_to_ptr.vmem [resolvable:$true] %s66_s18 }
  0x47   :  { %p445_p5 = scmp.lt.u32.totalorder %s441_s23, %s632_s4 }
  0x49   :  { %p447_p6 = pnand %p445_p5, %p442_p4 }
  0x4b   :  { %450 = shalt.err (!%p447_p6)
}
  0x4c   :  { %s451_s28 = scalar_lea.vmem %s67_s18, 16  ;;  %s455_s2 = scalar_lea.vmem %s67_s18, 32 }
  0x4d   :  { %p452_p7 = scmp.ne.s32.totalorder %s67_s18, %s451_s28  ;;  %p456_p8 = scmp.lt.s32.totalorder %s67_s18, %s67_s18 }
  0x4e   :  { %p457_p9 = scmp.lt.s32.totalorder %s455_s2, %s451_s28 }
  0x50   :  { %p458_p10 = por %p457_p9, %p456_p8 }
  0x52   :  { %p459_p11 = pnand %p458_p10, %p452_p7 }
  0x54   :  { %462 = shalt.err (!%p459_p11)
}
  0x55   :  { %69 = dma.hbm_to_vmem [thread:$0]  %s632_s4, 16, %s67_s18, [#allocation9]  }
  0x56   :  { %485 = dma.done.wait [#allocation3], 256  }
  0x57   :  { %486 = vsyncadd [#allocation3], 4294967040 }
  0x58   :  { %487 = dma.done.wait [#allocation6], 272  }
  0x59   :  { %488 = vsyncadd [#allocation6], 4294967024 }
  0x5a   :  { %489 = dma.done.wait [#allocation9], 528  }
  0x5b   :  { %490 = vsyncadd [#allocation9], 4294966768  ;;  %vm96_vm0 = vcmask 130048   ;;  %v87_v0 = vld [vmem:[#allocation5] sm:$0xff]  ;;  %v88_v1 = vld [vmem:[#allocation5 + $0x8] sm:$0xff]  ;;  %vm180_vm1 = vcmask 261120  }
  0x5c   :  { %v85_v2 = vld [vmem:[#allocation2] sm:$0xff]  ;;  %v333_v3 = vpack.c.bf16 %v88_v1, %v87_v0  ;;  %v184_v5 = vld [vmem:[#allocation8 + $0x8] sm:$0xff]  ;;  %v185_v8 = vld [vmem:[#allocation8 + $0x10] sm:$0xff]  ;;  %s500_s4 = smov [#allocation11]  }
  0x5d   :  { %319 = vmatprep.mubr.msk.f32.mxu0 %vm96_vm0, %v85_v2  ;;  %v183_v4 = vld [vmem:[#allocation8] sm:$0xff]  ;;  %v186_v9 = vld [vmem:[#allocation8 + $0x18] sm:$0xff]  ;;  %s285_s3 = sshll.u32 %s500_s4, 4  ;;  %s286_s3 = int_to_ptr.vmem [resolvable:$true] %s285_s3 }
  0x5e   :  { %v337_v6 = vpack.c.bf16 %v184_v5, %v183_v4  ;;  %334 = vmatprep.subr.bf16.mxu0 %v333_v3  ;;  %v86_v7 = vld [vmem:[#allocation2 + $0x8] sm:$0xff]  ;;  %v341_v10 = vpack.c.bf16 %v186_v9, %v185_v8  ;;  %v299_v11 = vld [vmem:[#allocation7] ss:$0 sm:$0xff]  ;;  %v302_v18 = vld [vmem:[#allocation10] ss:$0 sm:$0xff]  ;;  %s463_s21 = scalar_lea.vmem %s286_s3, 512  ;;  %p468_p13 = scmp.lt.s32.totalorder %s286_s3, %s286_s3 }
  0x5f   :  { %336 = vmatpush3.bf16.msra.mxu0 %v333_v3  ;;  %p464_p12 = scmp.ne.s32.totalorder %s286_s3, %s463_s21  ;;  %p469_p0 = scmp.lt.s32.totalorder %s463_s21, %s463_s21 }
  0x60   :  { %338 = vmatprep.subr.bf16.mxu1 %v337_v6 }
  0x61   :  { %340 = vmatpush3.bf16.msra.mxu1 %v337_v6  ;;  %p470_p1 = por %p469_p0, %p468_p13 }
  0x62   :  { %320 = vmatmul.mubr.msk.f32.vlgmr.msra.gmra.mrb[0].mxu0 %vm96_vm0, %v86_v7  ;;  %342 = vmatprep.subr.bf16.mxu1 %v341_v10 }
  0x63   :  { %p471_p2 = pnand %p470_p1, %p464_p12 }
  0x65   :  { %344 = vmatpush3.bf16.msra.mxu1 %v341_v10 }
 0x135   :  { %v321_v12 = vpop.f32.mrb[0].mxu0 }
 0x136   :  { %v175_v13 = vadd.f32 %v321_v12, %v299_v11  ;;  %v169_v14 = vpop.f32.mrb[1].mxu0 }
 0x137   :  { %v170_v15 = vadd.f32 %v299_v11, %v169_v14 }
 0x138   :  { %v179_v16 = vmax.f32 %v175_v13, 0.0 }
 0x139   :  { %v178_v17 = vmax.f32 %v170_v15, 0.0 }
 0x13a   :  { %182 = vst.msk [vmem:[#allocation11 + $0x8] sm:$0xff] %vm180_vm1, %v179_v16 }
 0x13b   :  { %181 = vst.msk [vmem:[#allocation11] sm:$0xff] %vm180_vm1, %v178_v17  ;;  %330 = vmatprep.mubr.msk.f32.mxu1 %vm180_vm1, %v178_v17 }
 0x13c   :  { %331 = vmatmul.mubr.msk.f32.vlgmr.msra.gmra.mrb[0].mxu1 %vm180_vm1, %v179_v16 }
 0x20f   :  { %v332_v19 = vpop.f32.mrb[0].mxu1 }
 0x210   :  { %v272_v20 = vadd.f32 %v332_v19, %v302_v18  ;;  %v266_v21 = vpop.f32.mrb[1].mxu1 }
 0x211   :  { %v267_v22 = vadd.f32 %v302_v18, %v266_v21 }
 0x212   :  { %v276_v23 = vmax.f32 %v272_v20, 0.0 }
 0x213   :  { %v275_v24 = vmax.f32 %v267_v22, 0.0 }
 0x214   :  { %279 = vst.msk [vmem:[#allocation11 + $0x18] sm:$0xff] %vm180_vm1, %v276_v23 }
 0x215   :  { %278 = vst.msk [vmem:[#allocation11 + $0x10] sm:$0xff] %vm180_vm1, %v275_v24 }
 0x216   :  { %474 = shalt.err (!%p471_p2)
}
 0x217   :  { %s475_s9 = scalar_lea.hbm %s633_s5, 512 }
 0x218   :  { %p476_p3 = scmp.ne.s32.totalorder %s633_s5, %s475_s9  ;;  %p479_p4 = scmp.lt.u32.totalorder %s475_s9, %s633_s5 }
 0x21a   :  { %p481_p5 = pnand %p479_p4, %p476_p3 }
 0x21c   :  { %484 = shalt.err (!%p481_p5)
}
 0x21d   :  { %291 = dma.vmem_to_hbm [thread:$0]  %s286_s3, 512, %s633_s5, [#allocation4], %s495_s30, %s495_s30, %s496_s6  }
 0x21e   :  { %491 = dma.done.wait [#allocation4], 512  }
 0x21f   :  { %492 = vsyncadd [#allocation4], 4294966784 }
 0x220   :  { %295 = vsyncpa [#allocation3], 1 }
 0x221   :  { %296 = vsyncpa [#allocation6], 1 }
 0x222   :  { %297 = vsyncpa [#allocation9], 1 }
 0x223   :  { %298 = vsyncpa [#allocation4], 1 }

// kernel: tpu_custom_call.1
= control target key start
LH: loop header
LB: loop body
LE: loop exit
PB: predicated region body
PF: predicated region fallthrough
CT: control target
= control target key end

     0   :  { %10 = vsyncpa [#allocation3], 0  ;;  %s628_s0 = inlined_call_operand.hbm [shape: f32[16,16], index: 0, kind: input, shape index: {}]   ;;  %s629_s1 = inlined_call_operand.hbm [shape: f32[16,32], index: 1, kind: input, shape index: {}]   ;;  %s630_s2 = inlined_call_operand.hbm [shape: f32[1,32], index: 2, kind: input, shape index: {}]   ;;  %s631_s3 = inlined_call_operand.hbm [shape: f32[32,32], index: 3, kind: input, shape index: {}]   ;;  %s632_s4 = inlined_call_operand.hbm [shape: f32[1,32], index: 4, kind: input, shape index: {}]   ;;  %s633_s5 = inlined_call_operand.hbm [shape: f32[2,16,32], index: 5, kind: output, shape index: {}]  }
   0x1   :  { %11 = vsyncpa [#allocation6], 0 }
   0x2   :  { %12 = vsyncpa [#allocation9], 0 }
   0x3   :  { %13 = vsyncpa [#allocation4], 0  ;;  %s493_s18 = smov [#allocation5]   ;;  %s494_s20 = smov [#allocation8]  }
   0x4   :  { %s31_s19 = sshll.u32 %s493_s18, 4  ;;  %s53_s21 = sshll.u32 %s494_s20, 4  ;;  %s32_s19 = int_to_ptr.vmem [resolvable:$true] %s31_s19  ;;  %s531_s21 = int_to_ptr.vmem [resolvable:$true] %s53_s21 }
   0x5   :  { %s353_s24 = scalar_lea.hbm %s629_s1, 256 }
   0x6   :  { %p354_p0 = scmp.ne.s32.totalorder %s629_s1, %s353_s24  ;;  %p357_p1 = scmp.lt.u32.totalorder %s353_s24, %s629_s1 }
   0x8   :  { %p359_p2 = pnand %p357_p1, %p354_p0 }
   0xa   :  { %362 = shalt.err (!%p359_p2)
}
   0xb   :  { %s363_s29 = scalar_lea.vmem %s32_s19, 256  ;;  %p368_p4 = scmp.lt.s32.totalorder %s32_s19, %s32_s19 }
   0xc   :  { %p364_p3 = scmp.ne.s32.totalorder %s32_s19, %s363_s29  ;;  %p369_p5 = scmp.lt.s32.totalorder %s363_s29, %s363_s29 }
   0xe   :  { %p370_p6 = por %p369_p5, %p368_p4 }
  0x10   :  { %p371_p7 = pnand %p370_p6, %p364_p3 }
  0x12   :  { %374 = shalt.err (!%p371_p7)
}
  0x13   :  { %s495_s30 = smov 128   ;;  %s496_s6 = smov 8  }
  0x14   :  { %37 = dma.hbm_to_vmem [thread:$0]  %s629_s1, 256, %s32_s19, [#allocation6], %s495_s30, %s495_s30, %s496_s6  }
  0x15   :  { %s375_s11 = scalar_lea.hbm %s631_s3, 512 }
  0x16   :  { %p376_p8 = scmp.ne.s32.totalorder %s631_s3, %s375_s11  ;;  %p379_p9 = scmp.lt.u32.totalorder %s375_s11, %s631_s3 }
  0x18   :  { %p381_p10 = pnand %p379_p9, %p376_p8 }
  0x1a   :  { %384 = shalt.err (!%p381_p10)
}
  0x1b   :  { %s385_s16 = scalar_lea.vmem %s531_s21, 512  ;;  %p390_p12 = scmp.lt.s32.totalorder %s531_s21, %s531_s21 }
  0x1c   :  { %p386_p11 = scmp.ne.s32.totalorder %s531_s21, %s385_s16  ;;  %p391_p13 = scmp.lt.s32.totalorder %s385_s16, %s385_s16 }
  0x1e   :  { %p392_p0 = por %p391_p13, %p390_p12 }
  0x20   :  { %p393_p1 = pnand %p392_p0, %p386_p11 }
  0x22   :  { %396 = shalt.err (!%p393_p1)
}
  0x23   :  { %59 = dma.hbm_to_vmem [thread:$0]  %s631_s3, 512, %s531_s21, [#allocation9], %s495_s30, %s495_s30, %s496_s6  }
  0x24   :  { %s497_s18 = smov [#allocation2]   ;;  %s498_s20 = smov [#allocation7]  }
  0x25   :  { %s19_s19 = sshll.u32 %s497_s18, 4  ;;  %s44_s22 = sshll.u32 %s498_s20, 4  ;;  %s20_s19 = int_to_ptr.vmem [resolvable:$true] %s19_s19  ;;  %s45_s22 = int_to_ptr.vmem [resolvable:$true] %s44_s22 }
  0x26   :  { %s397_s25 = scalar_lea.hbm %s628_s0, 256 }
  0x27   :  { %p398_p2 = scmp.ne.s32.totalorder %s628_s0, %s397_s25  ;;  %p401_p3 = scmp.lt.u32.totalorder %s397_s25, %s628_s0 }
  0x29   :  { %p403_p4 = pnand %p401_p3, %p398_p2 }
  0x2b   :  { %406 = shalt.err (!%p403_p4)
}
  0x2c   :  { %s407_s3 = scalar_lea.vmem %s20_s19, 256  ;;  %p412_p6 = scmp.lt.s32.totalorder %s20_s19, %s20_s19 }
  0x2d   :  { %p408_p5 = scmp.ne.s32.totalorder %s20_s19, %s407_s3  ;;  %p413_p7 = scmp.lt.s32.totalorder %s407_s3, %s407_s3 }
  0x2f   :  { %p414_p8 = por %p413_p7, %p412_p6 }
  0x31   :  { %p415_p9 = pnand %p414_p8, %p408_p5 }
  0x33   :  { %418 = shalt.err (!%p415_p9)
}
  0x34   :  { %25 = dma.hbm_to_vmem [thread:$0]  %s628_s0, 256, %s20_s19, [#allocation3], %s495_s30, %s495_s30, %s496_s6  }
  0x35   :  { %s419_s10 = scalar_lea.hbm %s630_s2, 16 }
  0x36   :  { %p420_p10 = scmp.ne.s32.totalorder %s630_s2, %s419_s10  ;;  %p423_p11 = scmp.lt.u32.totalorder %s419_s10, %s630_s2 }
  0x38   :  { %p425_p12 = pnand %p423_p11, %p420_p10 }
  0x3a   :  { %428 = shalt.err (!%p425_p12)
}
  0x3b   :  { %s429_s15 = scalar_lea.vmem %s45_s22, 16  ;;  %s433_s16 = scalar_lea.vmem %s45_s22, 32 }
  0x3c   :  { %p430_p13 = scmp.ne.s32.totalorder %s45_s22, %s429_s15  ;;  %p434_p0 = scmp.lt.s32.totalorder %s45_s22, %s45_s22 }
  0x3d   :  { %p435_p1 = scmp.lt.s32.totalorder %s433_s16, %s429_s15 }
  0x3f   :  { %p436_p2 = por %p435_p1, %p434_p0 }
  0x41   :  { %p437_p3 = pnand %p436_p2, %p430_p13 }
  0x43   :  { %440 = shalt.err (!%p437_p3)
}
  0x44   :  { %47 = dma.hbm_to_vmem [thread:$0]  %s630_s2, 16, %s45_s22, [#allocation6]  }
  0x45   :  { %s499_s17 = smov [#allocation10]   ;;  %s441_s23 = scalar_lea.hbm %s632_s4, 16 }
  0x46   :  { %s66_s18 = sshll.u32 %s499_s17, 4  ;;  %p442_p4 = scmp.ne.s32.totalorder %s632_s4, %s441_s23  ;;  %s67_s18 = int_to_ptr.vmem [resolvable:$true] %s66_s18 }
  0x47   :  { %p445_p5 = scmp.lt.u32.totalorder %s441_s23, %s632_s4 }
  0x49   :  { %p447_p6 = pnand %p445_p5, %p442_p4 }
  0x4b   :  { %450 = shalt.err (!%p447_p6)
}
  0x4c   :  { %s451_s28 = scalar_lea.vmem %s67_s18, 16  ;;  %s455_s2 = scalar_lea.vmem %s67_s18, 32 }
  0x4d   :  { %p452_p7 = scmp.ne.s32.totalorder %s67_s18, %s451_s28  ;;  %p456_p8 = scmp.lt.s32.totalorder %s67_s18, %s67_s18 }
  0x4e   :  { %p457_p9 = scmp.lt.s32.totalorder %s455_s2, %s451_s28 }
  0x50   :  { %p458_p10 = por %p457_p9, %p456_p8 }
  0x52   :  { %p459_p11 = pnand %p458_p10, %p452_p7 }
  0x54   :  { %462 = shalt.err (!%p459_p11)
}
  0x55   :  { %69 = dma.hbm_to_vmem [thread:$0]  %s632_s4, 16, %s67_s18, [#allocation9]  }
  0x56   :  { %485 = dma.done.wait [#allocation3], 256  }
  0x57   :  { %486 = vsyncadd [#allocation3], 4294967040 }
  0x58   :  { %487 = dma.done.wait [#allocation6], 272  }
  0x59   :  { %488 = vsyncadd [#allocation6], 4294967024 }
  0x5a   :  { %489 = dma.done.wait [#allocation9], 528  }
  0x5b   :  { %490 = vsyncadd [#allocation9], 4294966768  ;;  %vm96_vm0 = vcmask 130048   ;;  %v87_v0 = vld [vmem:[#allocation5] sm:$0xff]  ;;  %v88_v1 = vld [vmem:[#allocation5 + $0x8] sm:$0xff]  ;;  %vm180_vm1 = vcmask 261120  }
  0x5c   :  { %v85_v2 = vld [vmem:[#allocation2] sm:$0xff]  ;;  %v333_v3 = vpack.c.bf16 %v88_v1, %v87_v0  ;;  %v184_v5 = vld [vmem:[#allocation8 + $0x8] sm:$0xff]  ;;  %v185_v8 = vld [vmem:[#allocation8 + $0x10] sm:$0xff]  ;;  %s500_s4 = smov [#allocation11]  }
  0x5d   :  { %319 = vmatprep.mubr.msk.f32.mxu0 %vm96_vm0, %v85_v2  ;;  %v183_v4 = vld [vmem:[#allocation8] sm:$0xff]  ;;  %v186_v9 = vld [vmem:[#allocation8 + $0x18] sm:$0xff]  ;;  %s285_s3 = sshll.u32 %s500_s4, 4  ;;  %s286_s3 = int_to_ptr.vmem [resolvable:$true] %s285_s3 }
  0x5e   :  { %v337_v6 = vpack.c.bf16 %v184_v5, %v183_v4  ;;  %334 = vmatprep.subr.bf16.mxu0 %v333_v3  ;;  %v86_v7 = vld [vmem:[#allocation2 + $0x8] sm:$0xff]  ;;  %v341_v10 = vpack.c.bf16 %v186_v9, %v185_v8  ;;  %v299_v11 = vld [vmem:[#allocation7] ss:$0 sm:$0xff]  ;;  %v302_v18 = vld [vmem:[#allocation10] ss:$0 sm:$0xff]  ;;  %s463_s21 = scalar_lea.vmem %s286_s3, 512  ;;  %p468_p13 = scmp.lt.s32.totalorder %s286_s3, %s286_s3 }
  0x5f   :  { %336 = vmatpush3.bf16.msra.mxu0 %v333_v3  ;;  %p464_p12 = scmp.ne.s32.totalorder %s286_s3, %s463_s21  ;;  %p469_p0 = scmp.lt.s32.totalorder %s463_s21, %s463_s21 }
  0x60   :  { %338 = vmatprep.subr.bf16.mxu1 %v337_v6 }
  0x61   :  { %340 = vmatpush3.bf16.msra.mxu1 %v337_v6  ;;  %p470_p1 = por %p469_p0, %p468_p13 }
  0x62   :  { %320 = vmatmul.mubr.msk.f32.vlgmr.msra.gmra.mrb[0].mxu0 %vm96_vm0, %v86_v7  ;;  %342 = vmatprep.subr.bf16.mxu1 %v341_v10 }
  0x63   :  { %p471_p2 = pnand %p470_p1, %p464_p12 }
  0x65   :  { %344 = vmatpush3.bf16.msra.mxu1 %v341_v10 }
 0x135   :  { %v321_v12 = vpop.f32.mrb[0].mxu0 }
 0x136   :  { %v175_v13 = vadd.f32 %v321_v12, %v299_v11  ;;  %v169_v14 = vpop.f32.mrb[1].mxu0 }
 0x137   :  { %v170_v15 = vadd.f32 %v299_v11, %v169_v14 }
 0x138   :  { %v179_v16 = vmax.f32 %v175_v13, 0.0 }
 0x139   :  { %v178_v17 = vmax.f32 %v170_v15, 0.0 }
 0x13a   :  { %182 = vst.msk [vmem:[#allocation11 + $0x8] sm:$0xff] %vm180_vm1, %v179_v16 }
 0x13b   :  { %181 = vst.msk [vmem:[#allocation11] sm:$0xff] %vm180_vm1, %v178_v17  ;;  %330 = vmatprep.mubr.msk.f32.mxu1 %vm180_vm1, %v178_v17 }
 0x13c   :  { %331 = vmatmul.mubr.msk.f32.vlgmr.msra.gmra.mrb[0].mxu1 %vm180_vm1, %v179_v16 }
 0x20f   :  { %v332_v19 = vpop.f32.mrb[0].mxu1 }
 0x210   :  { %v272_v20 = vadd.f32 %v332_v19, %v302_v18  ;;  %v266_v21 = vpop.f32.mrb[1].mxu1 }
 0x211   :  { %v267_v22 = vadd.f32 %v302_v18, %v266_v21 }
 0x212   :  { %v276_v23 = vmax.f32 %v272_v20, 0.0 }
 0x213   :  { %v275_v24 = vmax.f32 %v267_v22, 0.0 }
 0x214   :  { %279 = vst.msk [vmem:[#allocation11 + $0x18] sm:$0xff] %vm180_vm1, %v276_v23 }
 0x215   :  { %278 = vst.msk [vmem:[#allocation11 + $0x10] sm:$0xff] %vm180_vm1, %v275_v24 }
 0x216   :  { %474 = shalt.err (!%p471_p2)
}
 0x217   :  { %s475_s9 = scalar_lea.hbm %s633_s5, 512 }
 0x218   :  { %p476_p3 = scmp.ne.s32.totalorder %s633_s5, %s475_s9  ;;  %p479_p4 = scmp.lt.u32.totalorder %s475_s9, %s633_s5 }
 0x21a   :  { %p481_p5 = pnand %p479_p4, %p476_p3 }
 0x21c   :  { %484 = shalt.err (!%p481_p5)
}
 0x21d   :  { %291 = dma.vmem_to_hbm [thread:$0]  %s286_s3, 512, %s633_s5, [#allocation4], %s495_s30, %s495_s30, %s496_s6  }
 0x21e   :  { %491 = dma.done.wait [#allocation4], 512  }
 0x21f   :  { %492 = vsyncadd [#allocation4], 4294966784 }
 0x220   :  { %295 = vsyncpa [#allocation3], 1 }
 0x221   :  { %296 = vsyncpa [#allocation6], 1 }
 0x222   :  { %297 = vsyncpa [#allocation9], 1 }
 0x223   :  { %298 = vsyncpa [#allocation4], 1 }

</bundles_post_ra>
